<compile_context>
chip_gen: v6e
topology: v6e:2x2x1
jax: 0.10.0
libtpu: 0.0.40
codegen_flags: <defaults>
</compile_context>

<pallas_src>
import functools

import jax
import jax.numpy as jnp
from jax import lax
from jax.experimental import pallas as pl
from jax.experimental.pallas import tpu as pltpu

LANE = 128


def _pick_row_tile(n):
    # Prefer 256 only when >= 2 row tiles remain (v7x has 2 TensorCores and the
    # batch axis is the only "parallel" axis); otherwise 128; tiny batches run
    # as a single full-extent tile.
    for tm in (256, 128):
        if n % tm == 0 and n // tm >= 2:
            return tm
    if n % 128 == 0:
        return 128
    return n


def _pick_queue_tile(kq):
    # Large queue tiles amortize the ~0.35 us fixed per-grid-step overhead.
    # tk=2048: queue block 0.5 MiB (bf16) x2 buffers + ~1 MiB l_neg temp —
    # well under the default scoped VMEM on v5e/v6e/v7x.
    for tk in (2048, 1024, 512, 256, 128):
        if kq >= tk and kq % tk == 0:
            return tk
    raise ValueError("queue length must be a multiple of 128")


# ----------------------------------------------------------------------------
# Kernel 1: synthetic encoder head.
#   feat = GAP(im) (computed in XLA);  h = relu(feat @ W1 + b1)
#   head = h @ [Wc|We] + [bc|be];  output = head[:, :cls]; q = l2_norm(head[:, cls:])
# ----------------------------------------------------------------------------
def encoder_kernel(feat_ref, w1_ref, b1_ref, wh_ref, bh_ref, out_ref, q_ref, *,
                   cls_num):
    h = jnp.dot(feat_ref[...], w1_ref[...], preferred_element_type=jnp.float32)
    h = jnp.maximum(h + b1_ref[...], 0.0)                          # (TM, hidden)
    head = (jnp.dot(h, wh_ref[...], preferred_element_type=jnp.float32)
            + bh_ref[...])                                         # fused heads
    out_ref[...] = head[:, :cls_num]                               # class logits
    e = head[:, cls_num:]                                          # embedding
    inv_norm = lax.rsqrt(jnp.sum(e * e, axis=-1, keepdims=True) + 1e-12)
    q_ref[...] = e * inv_norm


def encoder_forward(im, params, *, cls_num):
    """im: (N, C, H, W) f32 -> (output (N, cls), q (N, dim) L2-normalized)."""
    N, C, H, W = im.shape
    # Spatial mean in XLA: keeps the kernel's input block tiny (tm, C) even for
    # real image sizes (avoids VMEM blowup on the 64 MiB v7x part).
    feat = jnp.mean(im.astype(jnp.float32).reshape(N, C, H * W), axis=-1)
    hidden = params["w1"].shape[1]
    head_w = params["wh"].shape[1]
    dim = head_w - cls_num
    tm = _pick_row_tile(N)
    out_shape = (jax.ShapeDtypeStruct((N, cls_num), jnp.float32),
                 jax.ShapeDtypeStruct((N, dim), jnp.float32))
    return pl.pallas_call(
        functools.partial(encoder_kernel, cls_num=cls_num),
        grid_spec=pltpu.PrefetchScalarGridSpec(
            num_scalar_prefetch=0, grid=(N // tm,),
            in_specs=[
                pl.BlockSpec((tm, C), lambda i: (i, 0)),
                pl.BlockSpec((C, hidden), lambda i: (0, 0)),
                pl.BlockSpec((1, hidden), lambda i: (0, 0)),
                pl.BlockSpec((hidden, head_w), lambda i: (0, 0)),
                pl.BlockSpec((1, head_w), lambda i: (0, 0)),
            ],
            out_specs=[
                pl.BlockSpec((tm, cls_num), lambda i: (i, 0)),
                pl.BlockSpec((tm, dim), lambda i: (i, 0)),
            ]),
        out_shape=out_shape,
        compiler_params=pltpu.CompilerParams(
            dimension_semantics=("parallel",)),
    )(feat, params["w1"], params["b1"], params["wh"], params["bh"])


# ----------------------------------------------------------------------------
# Kernel 2: contrastive per-sample InfoNCE loss (mask[:, 0] = 1 case) + fused
# prototype logits, tiled over the queue with an online logsumexp.
#   loss  = logsumexp([l_pos, l_neg] / T) - l_pos / T
#   proto = (q / T) @ prototypes.T
# The full (N, 1+Kq) logits tensor is never materialized (the PyTorch forward
# does not return it; it only feeds inst_loss).
# ----------------------------------------------------------------------------
def contrast_kernel(q_ref, k_ref, proto_t_ref, queue_ref,
                    loss_ref, proto_ref,
                    qs_sc, lpos_sc, m_sc, s_sc, *, inv_T):
    j = pl.program_id(1)

    @pl.when(j == 0)
    def _():
        qs = q_ref[...] * inv_T                 # scale once per row tile
        qs_sc[...] = qs
        lpos = jnp.sum(qs * k_ref[...], axis=-1, keepdims=True)   # (TM, 1), /T
        lpos_sc[...] = lpos
        m_sc[...] = lpos
        s_sc[...] = jnp.ones_like(lpos)         # exp(lpos - lpos) = 1

    # l_neg tile on the MXU: bf16 x bf16 with f32 accumulation.
    lneg = jnp.dot(qs_sc[...].astype(jnp.bfloat16), queue_ref[...],
                   preferred_element_type=jnp.float32)             # (TM, TK)
    m_prev = m_sc[...]
    m_new = jnp.maximum(m_prev, jnp.max(lneg, axis=-1, keepdims=True))
    s_sc[...] = (s_sc[...] * jnp.exp(m_prev - m_new) +
                 jnp.sum(jnp.exp(lneg - m_new), axis=-1, keepdims=True))
    m_sc[...] = m_new

    @pl.when(j == pl.num_programs(1) - 1)
    def _():
        # Fused prototype logits: saves a separate pallas_call + q re-read.
        proto_ref[...] = jnp.dot(qs_sc[...], proto_t_ref[...],
                                 preferred_element_type=jnp.float32)
        lse = m_sc[...] + jnp.log(s_sc[...])
        loss_ref[...] = jnp.broadcast_to(lse - lpos_sc[...], loss_ref.shape)


def contrast_proto_forward(q, k, queue, prototypes, inv_T):
    """q, k: (N, dim) f32; queue: (dim, Kq) bf16; prototypes: (cls, dim) f32.

    Returns (per_sample_loss (N,), logits_proto (N, cls))."""
    N, dim = q.shape
    Kq = queue.shape[1]
    cls_num = prototypes.shape[0]
    tk = _pick_queue_tile(Kq)
    tm = _pick_row_tile(N)
    protos_t = jnp.transpose(prototypes)        # (dim, cls): small, done once,
    grid = (N // tm, Kq // tk)                  # avoids per-tile XLU transpose
    loss_pad, logits_proto = pl.pallas_call(
        functools.partial(contrast_kernel, inv_T=inv_T),
        grid_spec=pltpu.PrefetchScalarGridSpec(
            num_scalar_prefetch=0, grid=grid,
            in_specs=[
                pl.BlockSpec((tm, dim), lambda i, j: (i, 0)),
                pl.BlockSpec((tm, dim), lambda i, j: (i, 0)),
                pl.BlockSpec((dim, cls_num), lambda i, j: (0, 0)),
                pl.BlockSpec((dim, tk), lambda i, j: (0, j)),
            ],
            out_specs=[
                pl.BlockSpec((tm, LANE), lambda i, j: (i, 0)),
                pl.BlockSpec((tm, cls_num), lambda i, j: (i, 0)),
            ],
            scratch_shapes=[pltpu.VMEM((tm, dim), jnp.float32),   # q/T
                            pltpu.VMEM((tm, 1), jnp.float32),     # l_pos
                            pltpu.VMEM((tm, 1), jnp.float32),     # running max
                            pltpu.VMEM((tm, 1), jnp.float32)]),   # running sum
        out_shape=(jax.ShapeDtypeStruct((N, LANE), jnp.float32),
                   jax.ShapeDtypeStruct((N, cls_num), jnp.float32)),
        compiler_params=pltpu.CompilerParams(
            dimension_semantics=("parallel", "arbitrary")),
    )(q, k, protos_t, queue)
    return loss_pad[:, 0], logits_proto


# ----------------------------------------------------------------------------
# PNL forward (training mode), functional over buffers.
# ----------------------------------------------------------------------------
def pnl_forward(state, cfg, im_q, im_k, target, *, is_proto=True,
                is_clean=False):
    m1, m2 = cfg["m1"], cfg["m2"]
    # momentum update of key encoder
    params_k = jax.tree_util.tree_map(
        lambda pk, pq: pk * m1 + pq * (1.0 - m1),
        state["params_k"], state["params_q"])

    cls_num, dim = state["prototypes"].shape
    # _batch_shuffle_ddp / _batch_unshuffle_ddp / concat_all_gather: identity on
    # a single device.
    output, q = encoder_forward(im_q, state["params_q"], cls_num=cls_num)
    _, k = encoder_forward(im_k, params_k, cls_num=cls_num)
    k = lax.stop_gradient(k)

    inv_T = 1.0 / cfg["T"]
    N = q.shape[0]
    Kq = state["queue"].shape[1]

    per_loss, logits_proto_full = contrast_proto_forward(
        q, k, state["queue"], state["prototypes"], inv_T)
    # non-supcont mask has a single 1 at column 0 -> loss = -log_softmax[:, 0]
    inst_loss = jnp.mean(per_loss)

    logits_proto = logits_proto_full if is_proto else jnp.zeros((), jnp.float32)

    if is_clean:
        soft_label = (cfg["alpha"] * jax.nn.softmax(output, axis=1) +
                      (1.0 - cfg["alpha"]) * jax.nn.softmax(logits_proto, axis=1))
        max_score = jnp.max(soft_label, axis=1)
        hard_label = jnp.argmax(soft_label, axis=1).astype(target.dtype)
        target = jnp.where(max_score > cfg["pseudo_th"], hard_label, target)

    # _dequeue_and_enqueue (single device).
    # TODO(synk): the wrap-around branch (ptr + N > K) of the PyTorch enqueue is
    # data-dependent Python control flow; only the ptr + N <= K path is modeled
    # (dynamic_update_slice clamps rather than wraps).
    ptr = state["queue_ptr"]
    queue = lax.dynamic_update_slice(
        state["queue"], jnp.transpose(k).astype(state["queue"].dtype),
        (jnp.int32(0), ptr))
    queue_id = lax.dynamic_update_slice(
        state["queue_id"], target[:, None].astype(state["queue_id"].dtype),
        (ptr, jnp.int32(0)))
    new_ptr = (ptr + N) % Kq

    # prototype EMA, vectorized but equivalent to the sequential loop (the
    # reference normalizes once after the loop):
    # sample i (label l) contributes with weight (1-m2)*m2^{#later same-label},
    # and each prototype decays by m2^{count(label)}.
    onehot = jax.nn.one_hot(target, cls_num, dtype=jnp.float32)       # (N, cls)
    counts = jnp.sum(onehot, axis=0)                                   # (cls,)
    suffix = jnp.cumsum(onehot[::-1], axis=0)[::-1] - onehot           # later same-label counts
    r = jnp.sum(suffix * onehot, axis=1)                               # (N,)
    w = (1.0 - m2) * jnp.power(m2, r)                                  # (N,)
    update = jnp.dot((onehot * w[:, None]).T, q,
                     preferred_element_type=jnp.float32)               # (cls, dim)
    protos = state["prototypes"] * jnp.power(m2, counts)[:, None] + update
    pnorm = jnp.maximum(
        jnp.sqrt(jnp.sum(protos * protos, axis=1, keepdims=True)), 1e-12)
    protos = protos / pnorm

    inst_accs = None  # topk=() -> no accuracy computation
    new_state = dict(state, params_k=params_k, queue=queue, queue_id=queue_id,
                     queue_ptr=new_ptr, prototypes=protos)
    # Same 5-tuple the PyTorch forward returns (the big logits tensor is not
    # part of the module's return value, so it is never materialized).
    return (output, target, inst_loss, logits_proto, inst_accs), new_state


# ----------------------------------------------------------------------------
# Deterministic parameter / buffer init (classifier+embedding heads fused)
# ----------------------------------------------------------------------------
def init_encoder_params(key, c_in, hidden, dim, cls_num):
    k1, k2, k3 = jax.random.split(key, 3)
    s = 0.05
    wc = s * jax.random.normal(k2, (hidden, cls_num), jnp.float32)
    we = s * jax.random.normal(k3, (hidden, dim), jnp.float32)
    return {
        "w1": s * jax.random.normal(k1, (c_in, hidden), jnp.float32),
        "b1": jnp.zeros((1, hidden), jnp.float32),
        # one fused head weight -> single MXU pass in the encoder kernel
        "wh": jnp.concatenate([wc, we], axis=1),
        "bh": jnp.zeros((1, cls_num + dim), jnp.float32),
    }


if __name__ == "__main__":
    key = jax.random.PRNGKey(0)
    kp, kq_img, kk_img, ktgt, kqueue = jax.random.split(key, 5)

    # small, lane-aligned shapes consistent with the module's forward
    N, C, H, W = 8, 4, 16, 16
    hidden, dim, Kq, cls_num = 128, 128, 1024, 128
    cfg = dict(T=0.1, m1=0.999, m2=0.999, alpha=0.5, pseudo_th=0.8)

    params_q = init_encoder_params(kp, C, hidden, dim, cls_num)
    # Real copy (param_k.data.copy_(param_q.data)); also guarantees no buffer
    # aliasing inside the state pytree.
    params_k = jax.tree_util.tree_map(jnp.copy, params_q)

    queue = jax.random.normal(kqueue, (dim, Kq), jnp.float32)
    queue = queue / jnp.maximum(
        jnp.sqrt(jnp.sum(queue * queue, axis=0, keepdims=True)), 1e-12)
    state = dict(
        params_q=params_q,
        params_k=params_k,
        queue=queue.astype(jnp.bfloat16),   # bf16 halves HBM bytes of q @ queue
        queue_id=-jnp.ones((Kq, 1), jnp.int32),
        queue_ptr=jnp.int32(0),
        prototypes=jnp.zeros((cls_num, dim), jnp.float32),
    )

    im_q = jax.random.normal(kq_img, (N, C, H, W), jnp.float32)
    im_k = jax.random.normal(kk_img, (N, C, H, W), jnp.float32)
    target = jax.random.randint(ktgt, (N,), 0, cls_num, jnp.int32)

    # No donation: the returned new_state provides the updated buffers; donating
    # the whole state previously tripped "donate the same buffer twice" when
    # leaves were aliased.
    @jax.jit
    def train_step(st, iq, ik, tgt):
        return pnl_forward(st, cfg, iq, ik, tgt, is_proto=True, is_clean=True)

    (output, target_out, inst_loss, logits_proto, inst_accs), new_state = \
        train_step(state, im_q, im_k, target)

    jax.block_until_ready(
        (output, target_out, inst_loss, logits_proto, new_state))

    assert output.shape == (N, cls_num)
    assert logits_proto.shape == (N, cls_num)
    assert target_out.shape == (N,)
    assert new_state["prototypes"].shape == (cls_num, dim)
    assert new_state["queue"].shape == (dim, Kq)
    assert bool(jnp.isfinite(inst_loss))
    # TODO(synk): torch.distributed all_gather / broadcast / randperm batch
    # shuffle have no single-device Pallas equivalent; treated as identity here.
    print("KERNEL_OK")
</pallas_src>

<mosaic_0001>
module attributes {stable_mosaic.version = 11 : i64} {
  func.func @encoder_kernel(%arg0: i32, %arg1: memref<8x4xf32, #tpu.memory_space<vmem>>, %arg2: memref<4x128xf32, #tpu.memory_space<vmem>>, %arg3: memref<1x128xf32, #tpu.memory_space<vmem>>, %arg4: memref<128x256xf32, #tpu.memory_space<vmem>>, %arg5: memref<1x256xf32, #tpu.memory_space<vmem>>, %arg6: memref<8x128xf32, #tpu.memory_space<vmem>>, %arg7: memref<8x128xf32, #tpu.memory_space<vmem>>) attributes {dimension_semantics = [#tpu.dimension_semantics<parallel>], iteration_bounds = array<i64: 1>, scalar_prefetch = 0 : i64, scratch_operands = 0 : i64, tpu.core_type = #tpu.core_type<tc>, window_params = [{transform_indices = @transform_0, window_bounds = array<i64: 8, 4>}, {pipeline_mode = #tpu.pipeline_mode<synchronous>, transform_indices = @transform_1, window_bounds = array<i64: 4, 128>}, {pipeline_mode = #tpu.pipeline_mode<synchronous>, transform_indices = @transform_2, window_bounds = array<i64: 1, 128>}, {pipeline_mode = #tpu.pipeline_mode<synchronous>, transform_indices = @transform_3, window_bounds = array<i64: 128, 256>}, {pipeline_mode = #tpu.pipeline_mode<synchronous>, transform_indices = @transform_4, window_bounds = array<i64: 1, 256>}, {transform_indices = @transform_5, window_bounds = array<i64: 8, 128>}, {transform_indices = @transform_6, window_bounds = array<i64: 8, 128>}]} {
    %c0 = arith.constant 0 : index
    %c0_0 = arith.constant 0 : index
    %0 = vector.load %arg1[%c0, %c0_0] : memref<8x4xf32, #tpu.memory_space<vmem>>, vector<8x4xf32>
    %c0_1 = arith.constant 0 : index
    %c0_2 = arith.constant 0 : index
    %1 = vector.load %arg2[%c0_1, %c0_2] : memref<4x128xf32, #tpu.memory_space<vmem>>, vector<4x128xf32>
    %cst = arith.constant dense<0.000000e+00> : vector<8x128xf32>
    %2 = tpu.matmul %0, %1, %cst {dimension_numbers = #tpu.dot_dimension_numbers<[1], [0], [0], [1], [0, 0, 1, 1], [], []>} : vector<8x4xf32>, vector<4x128xf32>, vector<8x128xf32> -> vector<8x128xf32>
    %c0_3 = arith.constant 0 : index
    %c0_4 = arith.constant 0 : index
    %3 = vector.load %arg3[%c0_3, %c0_4] : memref<1x128xf32, #tpu.memory_space<vmem>>, vector<1x128xf32>
    %4 = vector.broadcast %3 : vector<1x128xf32> to vector<8x128xf32>
    %5 = arith.addf %2, %4 : vector<8x128xf32>
    %cst_5 = arith.constant 0.000000e+00 : f32
    %6 = vector.broadcast %cst_5 : f32 to vector<8x128xf32>
    %7 = arith.maximumf %5, %6 : vector<8x128xf32>
    %c0_6 = arith.constant 0 : index
    %c0_7 = arith.constant 0 : index
    %8 = vector.load %arg4[%c0_6, %c0_7] : memref<128x256xf32, #tpu.memory_space<vmem>>, vector<128x256xf32>
    %cst_8 = arith.constant dense<0.000000e+00> : vector<8x256xf32>
    %9 = tpu.matmul %7, %8, %cst_8 {dimension_numbers = #tpu.dot_dimension_numbers<[1], [0], [0], [1], [0, 0, 1, 1], [], []>} : vector<8x128xf32>, vector<128x256xf32>, vector<8x256xf32> -> vector<8x256xf32>
    %c0_9 = arith.constant 0 : index
    %c0_10 = arith.constant 0 : index
    %10 = vector.load %arg5[%c0_9, %c0_10] : memref<1x256xf32, #tpu.memory_space<vmem>>, vector<1x256xf32>
    %11 = vector.broadcast %10 : vector<1x256xf32> to vector<8x256xf32>
    %12 = arith.addf %9, %11 : vector<8x256xf32>
    %13 = vector.extract_strided_slice %12 {offsets = [0, 0], sizes = [8, 128], strides = [1, 1]} : vector<8x256xf32> to vector<8x128xf32>
    %c0_11 = arith.constant 0 : index
    %c0_12 = arith.constant 0 : index
    %14 = vector.load %arg6[%c0_11, %c0_12] : memref<8x128xf32, #tpu.memory_space<vmem>>, vector<8x128xf32>
    tpu.vector_store %arg6[%c0_11, %c0_12], %13 {strides = array<i32>} : memref<8x128xf32, #tpu.memory_space<vmem>>, vector<8x128xf32>,
    %15 = vector.extract_strided_slice %12 {offsets = [0, 128], sizes = [8, 128], strides = [1, 1]} : vector<8x256xf32> to vector<8x128xf32>
    %16 = arith.mulf %15, %15 : vector<8x128xf32>
    %cst_13 = arith.constant dense<0.000000e+00> : vector<8xf32>
    %17 = vector.multi_reduction <add>, %16, %cst_13 [1] : vector<8x128xf32> to vector<8xf32>
    %18 = vector.shape_cast %17 : vector<8xf32> to vector<8x1xf32>
    %cst_14 = arith.constant 9.99999996E-13 : f32
    %19 = vector.broadcast %cst_14 : f32 to vector<8x1xf32>
    %20 = arith.addf %18, %19 : vector<8x1xf32>
    %21 = math.rsqrt %20 : vector<8x1xf32>
    %22 = vector.broadcast %21 : vector<8x1xf32> to vector<8x128xf32>
    %23 = arith.mulf %15, %22 : vector<8x128xf32>
    %c0_15 = arith.constant 0 : index
    %c0_16 = arith.constant 0 : index
    %24 = vector.load %arg7[%c0_15, %c0_16] : memref<8x128xf32, #tpu.memory_space<vmem>>, vector<8x128xf32>
    tpu.vector_store %arg7[%c0_15, %c0_16], %23 {strides = array<i32>} : memref<8x128xf32, #tpu.memory_space<vmem>>, vector<8x128xf32>,
    return
  }
  func.func @transform_0(%arg0: i32) -> (i32, i32) {
    %c0_i32 = arith.constant 0 : i32
    %c0_i32_0 = arith.constant 0 : i32
    return %arg0, %c0_i32 : i32, i32
  }
  func.func @transform_1(%arg0: i32) -> (i32, i32) {
    %c0_i32 = arith.constant 0 : i32
    %c0_i32_0 = arith.constant 0 : i32
    %c0_i32_1 = arith.constant 0 : i32
    return %c0_i32, %c0_i32_0 : i32, i32
  }
  func.func @transform_2(%arg0: i32) -> (i32, i32) {
    %c0_i32 = arith.constant 0 : i32
    %c0_i32_0 = arith.constant 0 : i32
    %c0_i32_1 = arith.constant 0 : i32
    return %c0_i32, %c0_i32_0 : i32, i32
  }
  func.func @transform_3(%arg0: i32) -> (i32, i32) {
    %c0_i32 = arith.constant 0 : i32
    %c0_i32_0 = arith.constant 0 : i32
    %c0_i32_1 = arith.constant 0 : i32
    return %c0_i32, %c0_i32_0 : i32, i32
  }
  func.func @transform_4(%arg0: i32) -> (i32, i32) {
    %c0_i32 = arith.constant 0 : i32
    %c0_i32_0 = arith.constant 0 : i32
    %c0_i32_1 = arith.constant 0 : i32
    return %c0_i32, %c0_i32_0 : i32, i32
  }
  func.func @transform_5(%arg0: i32) -> (i32, i32) {
    %c0_i32 = arith.constant 0 : i32
    %c0_i32_0 = arith.constant 0 : i32
    return %arg0, %c0_i32 : i32, i32
  }
  func.func @transform_6(%arg0: i32) -> (i32, i32) {
    %c0_i32 = arith.constant 0 : i32
    %c0_i32_0 = arith.constant 0 : i32
    return %arg0, %c0_i32 : i32, i32
  }
}

module attributes {stable_mosaic.version = 11 : i64} {
  func.func @encoder_kernel(%arg0: i32, %arg1: memref<8x4xf32, #tpu.memory_space<vmem>>, %arg2: memref<4x128xf32, #tpu.memory_space<vmem>>, %arg3: memref<1x128xf32, #tpu.memory_space<vmem>>, %arg4: memref<128x256xf32, #tpu.memory_space<vmem>>, %arg5: memref<1x256xf32, #tpu.memory_space<vmem>>, %arg6: memref<8x128xf32, #tpu.memory_space<vmem>>, %arg7: memref<8x128xf32, #tpu.memory_space<vmem>>) attributes {dimension_semantics = [#tpu.dimension_semantics<parallel>], iteration_bounds = array<i64: 1>, scalar_prefetch = 0 : i64, scratch_operands = 0 : i64, tpu.core_type = #tpu.core_type<tc>, window_params = [{transform_indices = @transform_0, window_bounds = array<i64: 8, 4>}, {pipeline_mode = #tpu.pipeline_mode<synchronous>, transform_indices = @transform_1, window_bounds = array<i64: 4, 128>}, {pipeline_mode = #tpu.pipeline_mode<synchronous>, transform_indices = @transform_2, window_bounds = array<i64: 1, 128>}, {pipeline_mode = #tpu.pipeline_mode<synchronous>, transform_indices = @transform_3, window_bounds = array<i64: 128, 256>}, {pipeline_mode = #tpu.pipeline_mode<synchronous>, transform_indices = @transform_4, window_bounds = array<i64: 1, 256>}, {transform_indices = @transform_5, window_bounds = array<i64: 8, 128>}, {transform_indices = @transform_6, window_bounds = array<i64: 8, 128>}]} {
    %c0 = arith.constant 0 : index
    %c0_0 = arith.constant 0 : index
    %0 = vector.load %arg1[%c0, %c0_0] : memref<8x4xf32, #tpu.memory_space<vmem>>, vector<8x4xf32>
    %c0_1 = arith.constant 0 : index
    %c0_2 = arith.constant 0 : index
    %1 = vector.load %arg2[%c0_1, %c0_2] : memref<4x128xf32, #tpu.memory_space<vmem>>, vector<4x128xf32>
    %cst = arith.constant dense<0.000000e+00> : vector<8x128xf32>
    %2 = tpu.matmul %0, %1, %cst {dimension_numbers = #tpu.dot_dimension_numbers<[1], [0], [0], [1], [0, 0, 1, 1], [], []>} : vector<8x4xf32>, vector<4x128xf32>, vector<8x128xf32> -> vector<8x128xf32>
    %c0_3 = arith.constant 0 : index
    %c0_4 = arith.constant 0 : index
    %3 = vector.load %arg3[%c0_3, %c0_4] : memref<1x128xf32, #tpu.memory_space<vmem>>, vector<1x128xf32>
    %4 = vector.broadcast %3 : vector<1x128xf32> to vector<8x128xf32>
    %5 = arith.addf %2, %4 : vector<8x128xf32>
    %cst_5 = arith.constant 0.000000e+00 : f32
    %6 = vector.broadcast %cst_5 : f32 to vector<8x128xf32>
    %7 = arith.maximumf %5, %6 : vector<8x128xf32>
    %c0_6 = arith.constant 0 : index
    %c0_7 = arith.constant 0 : index
    %8 = vector.load %arg4[%c0_6, %c0_7] : memref<128x256xf32, #tpu.memory_space<vmem>>, vector<128x256xf32>
    %cst_8 = arith.constant dense<0.000000e+00> : vector<8x256xf32>
    %9 = tpu.matmul %7, %8, %cst_8 {dimension_numbers = #tpu.dot_dimension_numbers<[1], [0], [0], [1], [0, 0, 1, 1], [], []>} : vector<8x128xf32>, vector<128x256xf32>, vector<8x256xf32> -> vector<8x256xf32>
    %c0_9 = arith.constant 0 : index
    %c0_10 = arith.constant 0 : index
    %10 = vector.load %arg5[%c0_9, %c0_10] : memref<1x256xf32, #tpu.memory_space<vmem>>, vector<1x256xf32>
    %11 = vector.broadcast %10 : vector<1x256xf32> to vector<8x256xf32>
    %12 = arith.addf %9, %11 : vector<8x256xf32>
    %13 = vector.extract_strided_slice %12 {offsets = [0, 0], sizes = [8, 128], strides = [1, 1]} : vector<8x256xf32> to vector<8x128xf32>
    %c0_11 = arith.constant 0 : index
    %c0_12 = arith.constant 0 : index
    %14 = vector.load %arg6[%c0_11, %c0_12] : memref<8x128xf32, #tpu.memory_space<vmem>>, vector<8x128xf32>
    tpu.vector_store %arg6[%c0_11, %c0_12], %13 {strides = array<i32>} : memref<8x128xf32, #tpu.memory_space<vmem>>, vector<8x128xf32>,
    %15 = vector.extract_strided_slice %12 {offsets = [0, 128], sizes = [8, 128], strides = [1, 1]} : vector<8x256xf32> to vector<8x128xf32>
    %16 = arith.mulf %15, %15 : vector<8x128xf32>
    %cst_13 = arith.constant dense<0.000000e+00> : vector<8xf32>
    %17 = vector.multi_reduction <add>, %16, %cst_13 [1] : vector<8x128xf32> to vector<8xf32>
    %18 = vector.shape_cast %17 : vector<8xf32> to vector<8x1xf32>
    %cst_14 = arith.constant 9.99999996E-13 : f32
    %19 = vector.broadcast %cst_14 : f32 to vector<8x1xf32>
    %20 = arith.addf %18, %19 : vector<8x1xf32>
    %21 = math.rsqrt %20 : vector<8x1xf32>
    %22 = vector.broadcast %21 : vector<8x1xf32> to vector<8x128xf32>
    %23 = arith.mulf %15, %22 : vector<8x128xf32>
    %c0_15 = arith.constant 0 : index
    %c0_16 = arith.constant 0 : index
    %24 = vector.load %arg7[%c0_15, %c0_16] : memref<8x128xf32, #tpu.memory_space<vmem>>, vector<8x128xf32>
    tpu.vector_store %arg7[%c0_15, %c0_16], %23 {strides = array<i32>} : memref<8x128xf32, #tpu.memory_space<vmem>>, vector<8x128xf32>,
    return
  }
  func.func @transform_0(%arg0: i32) -> (i32, i32) {
    %c0_i32 = arith.constant 0 : i32
    %c0_i32_0 = arith.constant 0 : i32
    return %arg0, %c0_i32 : i32, i32
  }
  func.func @transform_1(%arg0: i32) -> (i32, i32) {
    %c0_i32 = arith.constant 0 : i32
    %c0_i32_0 = arith.constant 0 : i32
    %c0_i32_1 = arith.constant 0 : i32
    return %c0_i32, %c0_i32_0 : i32, i32
  }
  func.func @transform_2(%arg0: i32) -> (i32, i32) {
    %c0_i32 = arith.constant 0 : i32
    %c0_i32_0 = arith.constant 0 : i32
    %c0_i32_1 = arith.constant 0 : i32
    return %c0_i32, %c0_i32_0 : i32, i32
  }
  func.func @transform_3(%arg0: i32) -> (i32, i32) {
    %c0_i32 = arith.constant 0 : i32
    %c0_i32_0 = arith.constant 0 : i32
    %c0_i32_1 = arith.constant 0 : i32
    return %c0_i32, %c0_i32_0 : i32, i32
  }
  func.func @transform_4(%arg0: i32) -> (i32, i32) {
    %c0_i32 = arith.constant 0 : i32
    %c0_i32_0 = arith.constant 0 : i32
    %c0_i32_1 = arith.constant 0 : i32
    return %c0_i32, %c0_i32_0 : i32, i32
  }
  func.func @transform_5(%arg0: i32) -> (i32, i32) {
    %c0_i32 = arith.constant 0 : i32
    %c0_i32_0 = arith.constant 0 : i32
    return %arg0, %c0_i32 : i32, i32
  }
  func.func @transform_6(%arg0: i32) -> (i32, i32) {
    %c0_i32 = arith.constant 0 : i32
    %c0_i32_0 = arith.constant 0 : i32
    return %arg0, %c0_i32 : i32, i32
  }
}

module attributes {stable_mosaic.version = 11 : i64} {
  func.func @contrast_kernel(%arg0: i32, %arg1: i32, %arg2: memref<8x128xf32, #tpu.memory_space<vmem>>, %arg3: memref<8x128xf32, #tpu.memory_space<vmem>>, %arg4: memref<128x128xf32, #tpu.memory_space<vmem>>, %arg5: memref<128x1024xbf16, #tpu.memory_space<vmem>>, %arg6: memref<8x128xf32, #tpu.memory_space<vmem>>, %arg7: memref<8x128xf32, #tpu.memory_space<vmem>>, %arg8: memref<8x128xf32, #tpu.memory_space<vmem>>, %arg9: memref<8x1xf32, #tpu.memory_space<vmem>>, %arg10: memref<8x1xf32, #tpu.memory_space<vmem>>, %arg11: memref<8x1xf32, #tpu.memory_space<vmem>>) attributes {dimension_semantics = [#tpu.dimension_semantics<parallel>, #tpu.dimension_semantics<arbitrary>], iteration_bounds = array<i64: 1, 1>, scalar_prefetch = 0 : i64, scratch_operands = 4 : i64, tpu.core_type = #tpu.core_type<tc>, window_params = [{transform_indices = @transform_0, window_bounds = array<i64: 8, 128>}, {transform_indices = @transform_1, window_bounds = array<i64: 8, 128>}, {pipeline_mode = #tpu.pipeline_mode<synchronous>, transform_indices = @transform_2, window_bounds = array<i64: 128, 128>}, {transform_indices = @transform_3, window_bounds = array<i64: 128, 1024>}, {transform_indices = @transform_4, window_bounds = array<i64: 8, 128>}, {transform_indices = @transform_5, window_bounds = array<i64: 8, 128>}]} {
    %c0_i32 = arith.constant 0 : i32
    %0 = arith.cmpi eq, %arg1, %c0_i32 : i32
    %1 = arith.extui %0 : i1 to i32
    %c0_i32_0 = arith.constant 0 : i32
    %2 = arith.cmpi ne, %1, %c0_i32_0 : i32
    scf.if %2 {
      %c0_16 = arith.constant 0 : index
      %c0_17 = arith.constant 0 : index
      %26 = vector.load %arg2[%c0_16, %c0_17] : memref<8x128xf32, #tpu.memory_space<vmem>>, vector<8x128xf32>
      %cst_18 = arith.constant 1.000000e+01 : f32
      %27 = vector.broadcast %cst_18 : f32 to vector<8x128xf32>
      %28 = arith.mulf %26, %27 : vector<8x128xf32>
      %c0_19 = arith.constant 0 : index
      %c0_20 = arith.constant 0 : index
      %29 = vector.load %arg8[%c0_19, %c0_20] : memref<8x128xf32, #tpu.memory_space<vmem>>, vector<8x128xf32>
      tpu.vector_store %arg8[%c0_19, %c0_20], %28 {strides = array<i32>} : memref<8x128xf32, #tpu.memory_space<vmem>>, vector<8x128xf32>,
      %c0_21 = arith.constant 0 : index
      %c0_22 = arith.constant 0 : index
      %30 = vector.load %arg3[%c0_21, %c0_22] : memref<8x128xf32, #tpu.memory_space<vmem>>, vector<8x128xf32>
      %31 = arith.mulf %28, %30 : vector<8x128xf32>
      %cst_23 = arith.constant dense<0.000000e+00> : vector<8xf32>
      %32 = vector.multi_reduction <add>, %31, %cst_23 [1] : vector<8x128xf32> to vector<8xf32>
      %33 = vector.shape_cast %32 : vector<8xf32> to vector<8x1xf32>
      %c0_24 = arith.constant 0 : index
      %c0_25 = arith.constant 0 : index
      %34 = vector.load %arg9[%c0_24, %c0_25] : memref<8x1xf32, #tpu.memory_space<vmem>>, vector<8x1xf32>
      tpu.vector_store %arg9[%c0_24, %c0_25], %33 {strides = array<i32>} : memref<8x1xf32, #tpu.memory_space<vmem>>, vector<8x1xf32>,
      %c0_26 = arith.constant 0 : index
      %c0_27 = arith.constant 0 : index
      %35 = vector.load %arg10[%c0_26, %c0_27] : memref<8x1xf32, #tpu.memory_space<vmem>>, vector<8x1xf32>
      tpu.vector_store %arg10[%c0_26, %c0_27], %33 {strides = array<i32>} : memref<8x1xf32, #tpu.memory_space<vmem>>, vector<8x1xf32>,
      %cst_28 = arith.constant 1.000000e+00 : f32
      %36 = vector.broadcast %cst_28 : f32 to vector<8x1xf32>
      %c0_29 = arith.constant 0 : index
      %c0_30 = arith.constant 0 : index
      %37 = vector.load %arg11[%c0_29, %c0_30] : memref<8x1xf32, #tpu.memory_space<vmem>>, vector<8x1xf32>
      tpu.vector_store %arg11[%c0_29, %c0_30], %36 {strides = array<i32>} : memref<8x1xf32, #tpu.memory_space<vmem>>, vector<8x1xf32>,
    } else {
    }
    %c0 = arith.constant 0 : index
    %c0_1 = arith.constant 0 : index
    %3 = vector.load %arg8[%c0, %c0_1] : memref<8x128xf32, #tpu.memory_space<vmem>>, vector<8x128xf32>
    %4 = arith.truncf %3 : vector<8x128xf32> to vector<8x128xbf16>
    %c0_2 = arith.constant 0 : index
    %c0_3 = arith.constant 0 : index
    %5 = vector.load %arg5[%c0_2, %c0_3] : memref<128x1024xbf16, #tpu.memory_space<vmem>>, vector<128x1024xbf16>
    %cst = arith.constant dense<0.000000e+00> : vector<8x1024xf32>
    %6 = tpu.matmul %4, %5, %cst {dimension_numbers = #tpu.dot_dimension_numbers<[1], [0], [0], [1], [0, 0, 1, 1], [], []>} : vector<8x128xbf16>, vector<128x1024xbf16>, vector<8x1024xf32> -> vector<8x1024xf32>
    %c0_4 = arith.constant 0 : index
    %c0_5 = arith.constant 0 : index
    %7 = vector.load %arg10[%c0_4, %c0_5] : memref<8x1xf32, #tpu.memory_space<vmem>>, vector<8x1xf32>
    %cst_6 = arith.constant dense<0xFF800000> : vector<8xf32>
    %8 = vector.multi_reduction <maximumf>, %6, %cst_6 [1] : vector<8x1024xf32> to vector<8xf32>
    %9 = vector.shape_cast %8 : vector<8xf32> to vector<8x1xf32>
    %10 = arith.maximumf %7, %9 : vector<8x1xf32>
    %c0_7 = arith.constant 0 : index
    %c0_8 = arith.constant 0 : index
    %11 = vector.load %arg11[%c0_7, %c0_8] : memref<8x1xf32, #tpu.memory_space<vmem>>, vector<8x1xf32>
    %12 = arith.subf %7, %10 : vector<8x1xf32>
    %13 = math.exp %12 : vector<8x1xf32>
    %14 = arith.mulf %11, %13 : vector<8x1xf32>
    %15 = vector.broadcast %10 : vector<8x1xf32> to vector<8x1024xf32>
    %16 = arith.subf %6, %15 : vector<8x1024xf32>
    %17 = math.exp %16 : vector<8x1024xf32>
    %cst_9 = arith.constant dense<0.000000e+00> : vector<8xf32>
    %18 = vector.multi_reduction <add>, %17, %cst_9 [1] : vector<8x1024xf32> to vector<8xf32>
    %19 = vector.shape_cast %18 : vector<8xf32> to vector<8x1xf32>
    %20 = arith.addf %14, %19 : vector<8x1xf32>
    %c0_10 = arith.constant 0 : index
    %c0_11 = arith.constant 0 : index
    %21 = vector.load %arg11[%c0_10, %c0_11] : memref<8x1xf32, #tpu.memory_space<vmem>>, vector<8x1xf32>
    tpu.vector_store %arg11[%c0_10, %c0_11], %20 {strides = array<i32>} : memref<8x1xf32, #tpu.memory_space<vmem>>, vector<8x1xf32>,
    %c0_12 = arith.constant 0 : index
    %c0_13 = arith.constant 0 : index
    %22 = vector.load %arg10[%c0_12, %c0_13] : memref<8x1xf32, #tpu.memory_space<vmem>>, vector<8x1xf32>
    tpu.vector_store %arg10[%c0_12, %c0_13], %10 {strides = array<i32>} : memref<8x1xf32, #tpu.memory_space<vmem>>, vector<8x1xf32>,
    %c0_i32_14 = arith.constant 0 : i32
    %23 = arith.cmpi eq, %arg1, %c0_i32_14 : i32
    %24 = arith.extui %23 : i1 to i32
    %c0_i32_15 = arith.constant 0 : i32
    %25 = arith.cmpi ne, %24, %c0_i32_15 : i32
    scf.if %25 {
      %c0_16 = arith.constant 0 : index
      %c0_17 = arith.constant 0 : index
      %26 = vector.load %arg8[%c0_16, %c0_17] : memref<8x128xf32, #tpu.memory_space<vmem>>, vector<8x128xf32>
      %c0_18 = arith.constant 0 : index
      %c0_19 = arith.constant 0 : index
      %27 = vector.load %arg4[%c0_18, %c0_19] : memref<128x128xf32, #tpu.memory_space<vmem>>, vector<128x128xf32>
      %cst_20 = arith.constant dense<0.000000e+00> : vector<8x128xf32>
      %28 = tpu.matmul %26, %27, %cst_20 {dimension_numbers = #tpu.dot_dimension_numbers<[1], [0], [0], [1], [0, 0, 1, 1], [], []>} : vector<8x128xf32>, vector<128x128xf32>, vector<8x128xf32> -> vector<8x128xf32>
      %c0_21 = arith.constant 0 : index
      %c0_22 = arith.constant 0 : index
      %29 = vector.load %arg7[%c0_21, %c0_22] : memref<8x128xf32, #tpu.memory_space<vmem>>, vector<8x128xf32>
      tpu.vector_store %arg7[%c0_21, %c0_22], %28 {strides = array<i32>} : memref<8x128xf32, #tpu.memory_space<vmem>>, vector<8x128xf32>,
      %c0_23 = arith.constant 0 : index
      %c0_24 = arith.constant 0 : index
      %30 = vector.load %arg10[%c0_23, %c0_24] : memref<8x1xf32, #tpu.memory_space<vmem>>, vector<8x1xf32>
      %c0_25 = arith.constant 0 : index
      %c0_26 = arith.constant 0 : index
      %31 = vector.load %arg11[%c0_25, %c0_26] : memref<8x1xf32, #tpu.memory_space<vmem>>, vector<8x1xf32>
      %32 = math.log %31 : vector<8x1xf32>
      %33 = arith.addf %30, %32 : vector<8x1xf32>
      %c0_27 = arith.constant 0 : index
      %c0_28 = arith.constant 0 : index
      %34 = vector.load %arg9[%c0_27, %c0_28] : memref<8x1xf32, #tpu.memory_space<vmem>>, vector<8x1xf32>
      %35 = arith.subf %33, %34 : vector<8x1xf32>
      %36 = vector.shape_cast %35 : vector<8x1xf32> to vector<8x1xf32>
      %37 = vector.broadcast %36 : vector<8x1xf32> to vector<8x128xf32>
      %c0_29 = arith.constant 0 : index
      %c0_30 = arith.constant 0 : index
      %38 = vector.load %arg6[%c0_29, %c0_30] : memref<8x128xf32, #tpu.memory_space<vmem>>, vector<8x128xf32>
      tpu.vector_store %arg6[%c0_29, %c0_30], %37 {strides = array<i32>} : memref<8x128xf32, #tpu.memory_space<vmem>>, vector<8x128xf32>,
    } else {
    }
    return
  }
  func.func @transform_0(%arg0: i32, %arg1: i32) -> (i32, i32) {
    %c0_i32 = arith.constant 0 : i32
    %c0_i32_0 = arith.constant 0 : i32
    return %arg0, %c0_i32 : i32, i32
  }
  func.func @transform_1(%arg0: i32, %arg1: i32) -> (i32, i32) {
    %c0_i32 = arith.constant 0 : i32
    %c0_i32_0 = arith.constant 0 : i32
    return %arg0, %c0_i32 : i32, i32
  }
  func.func @transform_2(%arg0: i32, %arg1: i32) -> (i32, i32) {
    %c0_i32 = arith.constant 0 : i32
    %c0_i32_0 = arith.constant 0 : i32
    %c0_i32_1 = arith.constant 0 : i32
    return %c0_i32, %c0_i32_0 : i32, i32
  }
  func.func @transform_3(%arg0: i32, %arg1: i32) -> (i32, i32) {
    %c0_i32 = arith.constant 0 : i32
    %c0_i32_0 = arith.constant 0 : i32
    return %c0_i32, %arg1 : i32, i32
  }
  func.func @transform_4(%arg0: i32, %arg1: i32) -> (i32, i32) {
    %c0_i32 = arith.constant 0 : i32
    %c0_i32_0 = arith.constant 0 : i32
    return %arg0, %c0_i32 : i32, i32
  }
  func.func @transform_5(%arg0: i32, %arg1: i32) -> (i32, i32) {
    %c0_i32 = arith.constant 0 : i32
    %c0_i32_0 = arith.constant 0 : i32
    return %arg0, %c0_i32 : i32, i32
  }
}

</mosaic_0001>

<bundles_post_ra>
// kernel: train_step.3
= control target key start
LH: loop header
LB: loop body
LE: loop exit
PB: predicated region body
PF: predicated region fallthrough
CT: control target
= control target key end

     0   :  { %vm35_vm0 = vcmask 1043456   ;;  %vm31_vm1 = vcmask 31744   ;;  %v255_v0 = vmov 0.0   ;;  %vm256_vm2 = vmmov 0   ;;  %s406_s1 = inlined_call_operand.vmem [shape: f32[4,128], index: 1, kind: input, shape index: {}]   ;;  %s407_s0 = inlined_call_operand.vmem [shape: f32[8,4], index: 0, kind: input, shape index: {}]   ;;  %s408_s3 = inlined_call_operand.vmem [shape: f32[128,256], index: 3, kind: input, shape index: {}]   ;;  %s409_s2 = inlined_call_operand.vmem [shape: f32[1,128], index: 2, kind: input, shape index: {}]   ;;  %s410_s4 = inlined_call_operand.vmem [shape: f32[1,256], index: 4, kind: input, shape index: {}]   ;;  %s411_s5 = inlined_call_operand.vmem [shape: f32[8,128], index: 5, kind: output, shape index: {0}]   ;;  %s412_s6 = inlined_call_operand.vmem [shape: f32[8,128], index: 6, kind: output, shape index: {1}]  }
   0x1   :  { %246 = vmatprep.subr.mxu0 %v255_v0  ;;  %v23_v1 = vld [vmem:[%s406_s1] sm:$0xf]  ;;  %248 = vmatprep.mubr.msk.f32.mxu0 %vm256_vm2, %v255_v0  ;;  %v141_v3 = vld [vmem:[%s408_s3 + $0xf8] sm:$0xff]  ;;  %v140_v4 = vld [vmem:[%s408_s3 + $0xf0] sm:$0xff]  ;;  %v144_v40 = vlaneseq }
   0x2   :  { %v22_v2 = vld [vmem:[%s407_s0] sm:$0xff]  ;;  %247 = vmatpush3.msk.msra.mxu0 %vm35_vm0, %v23_v1  ;;  %154 = vmatprep.subr.mxu1 %v141_v3  ;;  %v139_v5 = vld [vmem:[%s408_s3 + $0xe8] sm:$0xff]  ;;  %v137_v7 = vld [vmem:[%s408_s3 + $0xd8] sm:$0xff] }
   0x3   :  { %v138_v6 = vld [vmem:[%s408_s3 + $0xe0] sm:$0xff]  ;;  %249 = vmatmul.mubr.msk.f32.vlgmr.msra.gmra.mxu0 %vm31_vm1, %v22_v2  ;;  %155 = vmatpush1.msra.mxu1 %v140_v4  ;;  %v136_v8 = vld [vmem:[%s408_s3 + $0xd0] sm:$0xff]  ;;  %v135_v9 = vld [vmem:[%s408_s3 + $0xc8] sm:$0xff]  ;;  %v145_v41 = vshrl.u32 %v144_v40, 7 }
   0x4   :  { %156 = vmatprep.subr.mxu1 %v139_v5  ;;  %218 = vmatprep.mubr.f32.mxu1 %v255_v0  ;;  %v134_v10 = vld [vmem:[%s408_s3 + $0xc0] sm:$0xff]  ;;  %v133_v11 = vld [vmem:[%s408_s3 + $0xb8] sm:$0xff]  ;;  %v132_v12 = vld [vmem:[%s408_s3 + $0xb0] sm:$0xff] }
   0x5   :  { %157 = vmatpush1.msra.mxu1 %v138_v6  ;;  %v131_v13 = vld [vmem:[%s408_s3 + $0xa8] sm:$0xff]  ;;  %v130_v14 = vld [vmem:[%s408_s3 + $0xa0] sm:$0xff]  ;;  %v129_v15 = vld [vmem:[%s408_s3 + $0x98] sm:$0xff]  ;;  %v146_v42 = vsub.s32 0, %v145_v41  ;;  %v150_v44 = vsub.s32 1, %v145_v41 }
   0x6   :  { %158 = vmatprep.subr.mxu1 %v137_v7  ;;  %v128_v16 = vld [vmem:[%s408_s3 + $0x90] sm:$0xff]  ;;  %v127_v17 = vld [vmem:[%s408_s3 + $0x88] sm:$0xff]  ;;  %v126_v18 = vld [vmem:[%s408_s3 + $0x80] sm:$0xff] }
   0x7   :  { %159 = vmatpush1.msra.mxu1 %v136_v8  ;;  %v125_v19 = vld [vmem:[%s408_s3 + $0x78] sm:$0xff]  ;;  %v124_v20 = vld [vmem:[%s408_s3 + $0x70] sm:$0xff]  ;;  %v123_v21 = vld [vmem:[%s408_s3 + $0x68] sm:$0xff] }
   0x8   :  { %160 = vmatprep.subr.mxu1 %v135_v9  ;;  %v122_v22 = vld [vmem:[%s408_s3 + $0x60] sm:$0xff]  ;;  %v121_v23 = vld [vmem:[%s408_s3 + $0x58] sm:$0xff]  ;;  %v120_v24 = vld [vmem:[%s408_s3 + $0x50] sm:$0xff] }
   0x9   :  { %161 = vmatpush1.msra.mxu1 %v134_v10  ;;  %v119_v25 = vld [vmem:[%s408_s3 + $0x48] sm:$0xff]  ;;  %v118_v26 = vld [vmem:[%s408_s3 + $0x40] sm:$0xff]  ;;  %v117_v27 = vld [vmem:[%s408_s3 + $0x38] sm:$0xff] }
   0xa   :  { %162 = vmatprep.subr.mxu1 %v133_v11  ;;  %v116_v28 = vld [vmem:[%s408_s3 + $0x30] sm:$0xff]  ;;  %v115_v29 = vld [vmem:[%s408_s3 + $0x28] sm:$0xff]  ;;  %v114_v30 = vld [vmem:[%s408_s3 + $0x20] sm:$0xff] }
   0xb   :  { %163 = vmatpush1.msra.mxu1 %v132_v12  ;;  %v113_v31 = vld [vmem:[%s408_s3 + $0x18] sm:$0xff]  ;;  %v112_v32 = vld [vmem:[%s408_s3 + $0x10] sm:$0xff]  ;;  %v111_v33 = vld [vmem:[%s408_s3 + $0x8] sm:$0xff] }
   0xc   :  { %164 = vmatprep.subr.mxu1 %v131_v13  ;;  %v110_v34 = vld [vmem:[%s408_s3] sm:$0xff] }
   0xd   :  { %165 = vmatpush1.msra.mxu1 %v130_v14  ;;  %v241_v35 = vld [vmem:[%s409_s2] ss:$0 sm:$0xff] }
   0xe   :  { %166 = vmatprep.subr.mxu1 %v129_v15  ;;  %v142_v43 = vld [vmem:[%s410_s4] sm:$0x3] }
   0xf   :  { %167 = vmatpush1.msra.mxu1 %v128_v16  ;;  %v147_v45 = vrot.slane %v142_v43, %v146_v42  ;;  %v151_v46 = vrot.slane %v142_v43, %v150_v44 }
  0x10   :  { %168 = vmatprep.subr.mxu1 %v127_v17 }
  0x11   :  { %169 = vmatpush1.msra.mxu1 %v126_v18 }
  0x12   :  { %170 = vmatprep.subr.mxu1 %v125_v19 }
  0x13   :  { %171 = vmatpush1.msra.mxu1 %v124_v20 }
  0x14   :  { %172 = vmatprep.subr.mxu1 %v123_v21 }
  0x15   :  { %173 = vmatpush1.msra.mxu1 %v122_v22 }
  0x16   :  { %174 = vmatprep.subr.mxu1 %v121_v23 }
  0x17   :  { %175 = vmatpush1.msra.mxu1 %v120_v24 }
  0x18   :  { %176 = vmatprep.subr.mxu1 %v119_v25 }
  0x19   :  { %177 = vmatpush1.msra.mxu1 %v118_v26 }
  0x1a   :  { %178 = vmatprep.subr.mxu1 %v117_v27 }
  0x1b   :  { %179 = vmatpush1.msra.mxu1 %v116_v28 }
  0x1c   :  { %180 = vmatprep.subr.mxu1 %v115_v29 }
  0x1d   :  { %181 = vmatpush1.msra.mxu1 %v114_v30 }
  0x1e   :  { %182 = vmatprep.subr.mxu1 %v113_v31 }
  0x1f   :  { %183 = vmatpush1.msra.mxu1 %v112_v32 }
  0x20   :  { %184 = vmatprep.subr.mxu1 %v111_v33 }
  0x21   :  { %185 = vmatpush1.msra.mxu1 %v110_v34 }
  0xc3   :  { %v105_v36 = vpop.f32.mrf.mxu0 }
  0xc4   :  { %v106_v37 = vadd.f32 %v241_v35, %v105_v36 }
  0xc5   :  { %v250_v38 = vpop.f32.mrf.mxu0 }
  0xc6   :  { %v109_v39 = vmax.f32 %v106_v37, 0.0 }
  0xc8   :  { %219 = vmatmul.mubr.f32.vlgmr.msra.gmra.mxu1 %v109_v39 }
 0x188   :  { %v220_v47 = vpop.f32.mrf.mxu1 }
 0x189   :  { %v221_v48 = vadd.f32 %v220_v47, %v147_v45 }
 0x18a   :  { %v222_v49 = vpop.f32.mrf.mxu1 }
 0x18b   :  { %225 = vst [vmem:[%s411_s5] sm:$0xff] %v221_v48  ;;  %v223_v50 = vadd.f32 %v222_v49, %v151_v46 }
 0x18d   :  { %v226_v51 = vmul.f32 %v223_v50, %v223_v50 }
 0x18f   :  { %227 = vadd.xlane.f32.xlu0 %v226_v51 }
 0x218   :  { %v228_v52 = vpop.xlane.xlu0 %227 }
 0x219   :  { %v229_v53 = vadd.f32 1e-12, %v228_v52 }
 0x21b   :  { %253 = vrsqrt.f32 %v229_v53 }
 0x228   :  { %v254_v54 = vpop.eup %253 }
 0x229   :  { %v231_v55 = vmul.f32 %v254_v54, %v223_v50 }
 0x22b   :  { %232 = vst [vmem:[%s412_s6] sm:$0xff] %v231_v55 }

// kernel: train_step.4
= control target key start
LH: loop header
LB: loop body
LE: loop exit
PB: predicated region body
PF: predicated region fallthrough
CT: control target
= control target key end

     0   :  { %vm36_vm0 = vcmask 1043456   ;;  %v289_v2 = vmov 0.0   ;;  %vm290_vm1 = vmmov 0   ;;  %vm32_vm2 = vcmask 31744   ;;  %s441_s0 = inlined_call_operand.vmem [shape: f32[8,4], index: 0, kind: input, shape index: {}]   ;;  %s442_s1 = inlined_call_operand.vmem [shape: f32[4,128], index: 1, kind: input, shape index: {}]   ;;  %s443_s2 = inlined_call_operand.vmem [shape: f32[1,128], index: 2, kind: input, shape index: {}]   ;;  %s444_s3 = inlined_call_operand.vmem [shape: f32[128,256], index: 3, kind: input, shape index: {}]   ;;  %s445_s4 = inlined_call_operand.vmem [shape: f32[1,256], index: 4, kind: input, shape index: {}]   ;;  %s446_s5 = inlined_call_operand.hbm [shape: f32[8,128], index: 5, kind: output, shape index: {0}]   ;;  %s447_s6 = inlined_call_operand.vmem [shape: f32[8,128], index: 6, kind: output, shape index: {1}]  }
   0x1   :  { %v24_v0 = vld [vmem:[%s442_s1] sm:$0xf]  ;;  %257 = vmatprep.subr.mxu0 %v289_v2  ;;  %259 = vmatprep.mubr.msk.f32.mxu0 %vm290_vm1, %v289_v2  ;;  %v142_v3 = vld [vmem:[%s444_s3 + $0xf8] sm:$0xff]  ;;  %v141_v4 = vld [vmem:[%s444_s3 + $0xf0] sm:$0xff] }
   0x2   :  { %v23_v1 = vld [vmem:[%s441_s0] sm:$0xff]  ;;  %v140_v5 = vld [vmem:[%s444_s3 + $0xe8] sm:$0xff]  ;;  %258 = vmatpush3.msk.msra.mxu0 %vm36_vm0, %v24_v0  ;;  %155 = vmatprep.subr.mxu1 %v142_v3  ;;  %v138_v7 = vld [vmem:[%s444_s3 + $0xd8] sm:$0xff] }
   0x3   :  { %v139_v6 = vld [vmem:[%s444_s3 + $0xe0] sm:$0xff]  ;;  %260 = vmatmul.mubr.msk.f32.vlgmr.msra.gmra.mxu0 %vm32_vm2, %v23_v1  ;;  %156 = vmatpush1.msra.mxu1 %v141_v4  ;;  %v137_v8 = vld [vmem:[%s444_s3 + $0xd0] sm:$0xff]  ;;  %v136_v9 = vld [vmem:[%s444_s3 + $0xc8] sm:$0xff] }
   0x4   :  { %157 = vmatprep.subr.mxu1 %v140_v5  ;;  %219 = vmatprep.mubr.f32.mxu1 %v289_v2  ;;  %v135_v10 = vld [vmem:[%s444_s3 + $0xc0] sm:$0xff]  ;;  %v134_v11 = vld [vmem:[%s444_s3 + $0xb8] sm:$0xff]  ;;  %v133_v12 = vld [vmem:[%s444_s3 + $0xb0] sm:$0xff] }
   0x5   :  { %158 = vmatpush1.msra.mxu1 %v139_v6  ;;  %v132_v13 = vld [vmem:[%s444_s3 + $0xa8] sm:$0xff]  ;;  %v131_v14 = vld [vmem:[%s444_s3 + $0xa0] sm:$0xff] }
   0x6   :  { %159 = vmatprep.subr.mxu1 %v138_v7 }
   0x7   :  { %160 = vmatpush1.msra.mxu1 %v137_v8 }
   0x8   :  { %161 = vmatprep.subr.mxu1 %v136_v9 }
   0x9   :  { %162 = vmatpush1.msra.mxu1 %v135_v10 }
   0xa   :  { %163 = vmatprep.subr.mxu1 %v134_v11 }
   0xb   :  { %12 = vsyncpa [#allocation3], 0  ;;  %164 = vmatpush1.msra.mxu1 %v133_v12  ;;  %v130_v15 = vld [vmem:[%s444_s3 + $0x98] sm:$0xff]  ;;  %v129_v16 = vld [vmem:[%s444_s3 + $0x90] sm:$0xff]  ;;  %v145_v40 = vlaneseq }
   0xc   :  { %165 = vmatprep.subr.mxu1 %v132_v13  ;;  %v128_v17 = vld [vmem:[%s444_s3 + $0x88] sm:$0xff]  ;;  %v127_v18 = vld [vmem:[%s444_s3 + $0x80] sm:$0xff]  ;;  %v126_v19 = vld [vmem:[%s444_s3 + $0x78] sm:$0xff] }
   0xd   :  { %166 = vmatpush1.msra.mxu1 %v131_v14  ;;  %v125_v20 = vld [vmem:[%s444_s3 + $0x70] sm:$0xff]  ;;  %v124_v21 = vld [vmem:[%s444_s3 + $0x68] sm:$0xff]  ;;  %v123_v22 = vld [vmem:[%s444_s3 + $0x60] sm:$0xff]  ;;  %v146_v41 = vshrl.u32 %v145_v40, 7 }
   0xe   :  { %167 = vmatprep.subr.mxu1 %v130_v15  ;;  %v122_v23 = vld [vmem:[%s444_s3 + $0x58] sm:$0xff]  ;;  %v121_v24 = vld [vmem:[%s444_s3 + $0x50] sm:$0xff]  ;;  %v120_v25 = vld [vmem:[%s444_s3 + $0x48] sm:$0xff] }
   0xf   :  { %168 = vmatpush1.msra.mxu1 %v129_v16  ;;  %v119_v26 = vld [vmem:[%s444_s3 + $0x40] sm:$0xff]  ;;  %v118_v27 = vld [vmem:[%s444_s3 + $0x38] sm:$0xff]  ;;  %v117_v28 = vld [vmem:[%s444_s3 + $0x30] sm:$0xff]  ;;  %v147_v42 = vsub.s32 0, %v146_v41  ;;  %v151_v44 = vsub.s32 1, %v146_v41 }
  0x10   :  { %169 = vmatprep.subr.mxu1 %v128_v17  ;;  %v116_v29 = vld [vmem:[%s444_s3 + $0x28] sm:$0xff]  ;;  %v115_v30 = vld [vmem:[%s444_s3 + $0x20] sm:$0xff]  ;;  %v114_v31 = vld [vmem:[%s444_s3 + $0x18] sm:$0xff] }
  0x11   :  { %170 = vmatpush1.msra.mxu1 %v127_v18  ;;  %v113_v32 = vld [vmem:[%s444_s3 + $0x10] sm:$0xff]  ;;  %v112_v33 = vld [vmem:[%s444_s3 + $0x8] sm:$0xff]  ;;  %v111_v34 = vld [vmem:[%s444_s3] sm:$0xff] }
  0x12   :  { %171 = vmatprep.subr.mxu1 %v126_v19  ;;  %v252_v35 = vld [vmem:[%s443_s2] ss:$0 sm:$0xff]  ;;  %s291_s2 = smov [#allocation2]  }
  0x13   :  { %172 = vmatpush1.msra.mxu1 %v125_v20  ;;  %v143_v43 = vld [vmem:[%s445_s4] sm:$0x3]  ;;  %s240_s3 = sshll.u32 %s291_s2, 4  ;;  %s241_s3 = int_to_ptr.vmem [resolvable:$true] %s240_s3 }
  0x14   :  { %173 = vmatprep.subr.mxu1 %v124_v21  ;;  %v148_v45 = vrot.slane %v143_v43, %v147_v42  ;;  %v152_v46 = vrot.slane %v143_v43, %v151_v44  ;;  %s267_s15 = scalar_lea.vmem %s241_s3, 128  ;;  %p272_p1 = scmp.lt.s32.totalorder %s241_s3, %s241_s3 }
  0x15   :  { %174 = vmatpush1.msra.mxu1 %v123_v22  ;;  %p268_p0 = scmp.ne.s32.totalorder %s241_s3, %s267_s15  ;;  %p273_p2 = scmp.lt.s32.totalorder %s267_s15, %s267_s15 }
  0x16   :  { %175 = vmatprep.subr.mxu1 %v122_v23 }
  0x17   :  { %176 = vmatpush1.msra.mxu1 %v121_v24  ;;  %p274_p3 = por %p273_p2, %p272_p1 }
  0x18   :  { %177 = vmatprep.subr.mxu1 %v120_v25 }
  0x19   :  { %178 = vmatpush1.msra.mxu1 %v119_v26  ;;  %p275_p4 = pnand %p274_p3, %p268_p0 }
  0x1a   :  { %179 = vmatprep.subr.mxu1 %v118_v27 }
  0x1b   :  { %180 = vmatpush1.msra.mxu1 %v117_v28 }
  0x1c   :  { %181 = vmatprep.subr.mxu1 %v116_v29 }
  0x1d   :  { %182 = vmatpush1.msra.mxu1 %v115_v30 }
  0x1e   :  { %183 = vmatprep.subr.mxu1 %v114_v31 }
  0x1f   :  { %184 = vmatpush1.msra.mxu1 %v113_v32 }
  0x20   :  { %185 = vmatprep.subr.mxu1 %v112_v33 }
  0x21   :  { %186 = vmatpush1.msra.mxu1 %v111_v34 }
  0xc3   :  { %v106_v36 = vpop.f32.mrf.mxu0 }
  0xc4   :  { %v107_v37 = vadd.f32 %v252_v35, %v106_v36 }
  0xc5   :  { %v261_v38 = vpop.f32.mrf.mxu0 }
  0xc6   :  { %v110_v39 = vmax.f32 %v107_v37, 0.0 }
  0xc8   :  { %220 = vmatmul.mubr.f32.vlgmr.msra.gmra.mxu1 %v110_v39 }
 0x188   :  { %v221_v47 = vpop.f32.mrf.mxu1 }
 0x189   :  { %v222_v48 = vadd.f32 %v221_v47, %v148_v45 }
 0x18a   :  { %v223_v49 = vpop.f32.mrf.mxu1 }
 0x18b   :  { %226 = vst [vmem:[#allocation2] sm:$0xff] %v222_v48  ;;  %v224_v50 = vadd.f32 %v223_v49, %v152_v46 }
 0x18d   :  { %v227_v51 = vmul.f32 %v224_v50, %v224_v50 }
 0x18f   :  { %228 = vadd.xlane.f32.xlu0 %v227_v51 }
 0x190   :  { %278 = shalt.err (!%p275_p4)
}
 0x191   :  { %243 = dma.vmem_to_hbm [thread:$0]  %s241_s3, 128, %s446_s5, [#allocation3]  }
 0x218   :  { %v229_v52 = vpop.xlane.xlu0 %228 }
 0x219   :  { %v230_v53 = vadd.f32 1e-12, %v229_v52 }
 0x21b   :  { %265 = vrsqrt.f32 %v230_v53 }
 0x228   :  { %v266_v54 = vpop.eup %265 }
 0x229   :  { %v232_v55 = vmul.f32 %v266_v54, %v224_v50 }
 0x22b   :  { %233 = vst [vmem:[%s447_s6] sm:$0xff] %v232_v55 }
 0x22c   :  { %287 = dma.done.wait [#allocation3], 128  }
 0x22d   :  { %288 = vsyncadd [#allocation3], 4294967168 }
 0x22e   :  { %251 = vsyncpa [#allocation3], 1 }

// kernel: train_step.5
= control target key start
LH: loop header
LB: loop body
LE: loop exit
PB: predicated region body
PF: predicated region fallthrough
CT: control target
= control target key end

     0   :  { %v897_v3 = vmov 0   ;;  %vm31_vm0 = vcmask 7168   ;;  %vm900_vm1 = vmmov 0   ;;  %s1250_s3 = inlined_call_operand.vmem [shape: bf16[128,1024], index: 3, kind: input, shape index: {}]   ;;  %s1251_s0 = inlined_call_operand.vmem [shape: f32[8,128], index: 0, kind: input, shape index: {}]   ;;  %s1252_s1 = inlined_call_operand.vmem [shape: f32[8,128], index: 1, kind: input, shape index: {}]   ;;  %s1253_s2 = inlined_call_operand.vmem [shape: f32[128,128], index: 2, kind: input, shape index: {}]   ;;  %s1254_s5 = inlined_call_operand.vmem [shape: f32[8,128], index: 5, kind: output, shape index: {1}]   ;;  %s1255_s4 = inlined_call_operand.vmem [shape: f32[8,128], index: 4, kind: output, shape index: {0}]  }
   0x1   :  { %v93_v0 = vld [vmem:[%s1250_s3 + $0x1c0] sm:$0xff]  ;;  %v94_v2 = vld [vmem:[%s1250_s3 + $0x1c8] sm:$0xff]  ;;  %453 = vmatprep.mubr.bf16.mxu0 %v897_v3  ;;  %494 = vmatprep.mubr.bf16.mxu1 %v897_v3 }
   0x2   :  { %v97_v1 = vld [vmem:[%s1250_s3 + $0x1e0] sm:$0xff]  ;;  %v98_v5 = vld [vmem:[%s1250_s3 + $0x1e8] sm:$0xff]  ;;  %875 = vset.pattern.permute.xlu1 %v897_v3  ;;  %876 = vset.pattern.permute.xlu0 %v897_v3 }
   0x3   :  { %v812_v4 = vcombine.high %v93_v0, %v97_v1  ;;  %v811_v6 = vcombine.low %v93_v0, %v97_v1  ;;  %v85_v7 = vld [vmem:[%s1250_s3 + $0x180] sm:$0xff]  ;;  %v814_v9 = vcombine.high %v94_v2, %v98_v5  ;;  %v813_v10 = vcombine.low %v94_v2, %v98_v5  ;;  %v86_v12 = vld [vmem:[%s1250_s3 + $0x188] sm:$0xff]  ;;  %v95_v0 = vld [vmem:[%s1250_s3 + $0x1d0] sm:$0xff] }
   0x4   :  { %v89_v8 = vld [vmem:[%s1250_s3 + $0x1a0] sm:$0xff]  ;;  %v90_v13 = vld [vmem:[%s1250_s3 + $0x1a8] sm:$0xff]  ;;  %v99_v1 = vld [vmem:[%s1250_s3 + $0x1f0] sm:$0xff] }
   0x5   :  { %v804_v11 = vcombine.high %v85_v7, %v89_v8  ;;  %v77_v14 = vld [vmem:[%s1250_s3 + $0x140] sm:$0xff]  ;;  %421 = vmatprep.subr.bf16.mxu0 %v812_v4  ;;  %v806_v15 = vcombine.high %v86_v12, %v90_v13  ;;  %v78_v17 = vld [vmem:[%s1250_s3 + $0x148] sm:$0xff]  ;;  %462 = vmatprep.subr.bf16.mxu1 %v814_v9  ;;  %v803_v19 = vcombine.low %v85_v7, %v89_v8  ;;  %v96_v4 = vld [vmem:[%s1250_s3 + $0x1d8] sm:$0xff] }
   0x6   :  { %v81_v16 = vld [vmem:[%s1250_s3 + $0x160] sm:$0xff]  ;;  %v82_v18 = vld [vmem:[%s1250_s3 + $0x168] sm:$0xff]  ;;  %422 = vmatpush1.bf16.msra.mxu0 %v811_v6  ;;  %463 = vmatpush1.bf16.msra.mxu1 %v813_v10  ;;  %v805_v20 = vcombine.low %v86_v12, %v90_v13  ;;  %v100_v5 = vld [vmem:[%s1250_s3 + $0x1f8] sm:$0xff]  ;;  %v816_v8 = vcombine.high %v95_v0, %v99_v1 }
   0x7   :  { %423 = vmatprep.subr.bf16.mxu0 %v804_v11  ;;  %v796_v21 = vcombine.high %v77_v14, %v81_v16  ;;  %464 = vmatprep.subr.bf16.mxu1 %v806_v15  ;;  %v798_v22 = vcombine.high %v78_v17, %v82_v18  ;;  %v69_v23 = vld [vmem:[%s1250_s3 + $0x100] sm:$0xff]  ;;  %v70_v25 = vld [vmem:[%s1250_s3 + $0x108] sm:$0xff]  ;;  %v795_v27 = vcombine.low %v77_v14, %v81_v16  ;;  %v87_v10 = vld [vmem:[%s1250_s3 + $0x190] sm:$0xff] }
   0x8   :  { %v73_v24 = vld [vmem:[%s1250_s3 + $0x120] sm:$0xff]  ;;  %v74_v26 = vld [vmem:[%s1250_s3 + $0x128] sm:$0xff]  ;;  %v797_v28 = vcombine.low %v78_v17, %v82_v18  ;;  %v818_v9 = vcombine.high %v96_v4, %v100_v5  ;;  %v91_v11 = vld [vmem:[%s1250_s3 + $0x1b0] sm:$0xff]  ;;  %v815_v15 = vcombine.low %v95_v0, %v99_v1  ;;  %v817_v16 = vcombine.low %v96_v4, %v100_v5 }
   0x9   :  { %v788_v29 = vcombine.high %v69_v23, %v73_v24  ;;  %v790_v30 = vcombine.high %v70_v25, %v74_v26  ;;  %v61_v31 = vld [vmem:[%s1250_s3 + $0xc0] sm:$0xff]  ;;  %v62_v33 = vld [vmem:[%s1250_s3 + $0xc8] sm:$0xff]  ;;  %v787_v35 = vcombine.low %v69_v23, %v73_v24  ;;  %v789_v36 = vcombine.low %v70_v25, %v74_v26  ;;  %v88_v13 = vld [vmem:[%s1250_s3 + $0x198] sm:$0xff] }
   0xa   :  { %424 = vmatpush1.bf16.msra.mxu0 %v803_v19  ;;  %465 = vmatpush1.bf16.msra.mxu1 %v805_v20  ;;  %v65_v32 = vld [vmem:[%s1250_s3 + $0xe0] sm:$0xff]  ;;  %v66_v34 = vld [vmem:[%s1250_s3 + $0xe8] sm:$0xff]  ;;  %v92_v14 = vld [vmem:[%s1250_s3 + $0x1b8] sm:$0xff]  ;;  %v808_v17 = vcombine.high %v87_v10, %v91_v11  ;;  %v807_v23 = vcombine.low %v87_v10, %v91_v11 }
   0xb   :  { %425 = vmatprep.subr.bf16.mxu0 %v796_v21  ;;  %466 = vmatprep.subr.bf16.mxu1 %v798_v22  ;;  %v780_v37 = vcombine.high %v61_v31, %v65_v32  ;;  %v782_v38 = vcombine.high %v62_v33, %v66_v34  ;;  %v53_v39 = vld [vmem:[%s1250_s3 + $0x80] sm:$0xff]  ;;  %v54_v41 = vld [vmem:[%s1250_s3 + $0x88] sm:$0xff]  ;;  %v779_v43 = vcombine.low %v61_v31, %v65_v32  ;;  %v79_v19 = vld [vmem:[%s1250_s3 + $0x150] sm:$0xff] }
   0xc   :  { %v57_v40 = vld [vmem:[%s1250_s3 + $0xa0] sm:$0xff]  ;;  %v58_v42 = vld [vmem:[%s1250_s3 + $0xa8] sm:$0xff]  ;;  %v781_v44 = vcombine.low %v62_v33, %v66_v34  ;;  %v810_v18 = vcombine.high %v88_v13, %v92_v14  ;;  %v83_v20 = vld [vmem:[%s1250_s3 + $0x170] sm:$0xff]  ;;  %v809_v24 = vcombine.low %v88_v13, %v92_v14 }
   0xd   :  { %v772_v45 = vcombine.high %v53_v39, %v57_v40  ;;  %v774_v46 = vcombine.high %v54_v41, %v58_v42  ;;  %v45_v47 = vld [vmem:[%s1250_s3 + $0x40] sm:$0xff]  ;;  %v46_v49 = vld [vmem:[%s1250_s3 + $0x48] sm:$0xff]  ;;  %v771_v51 = vcombine.low %v53_v39, %v57_v40  ;;  %v773_v52 = vcombine.low %v54_v41, %v58_v42  ;;  %v80_v21 = vld [vmem:[%s1250_s3 + $0x158] sm:$0xff] }
   0xe   :  { %426 = vmatpush1.bf16.msra.mxu0 %v795_v27  ;;  %467 = vmatpush1.bf16.msra.mxu1 %v797_v28  ;;  %v49_v48 = vld [vmem:[%s1250_s3 + $0x60] sm:$0xff]  ;;  %v50_v50 = vld [vmem:[%s1250_s3 + $0x68] sm:$0xff]  ;;  %v84_v22 = vld [vmem:[%s1250_s3 + $0x178] sm:$0xff]  ;;  %v800_v25 = vcombine.high %v79_v19, %v83_v20  ;;  %v799_v31 = vcombine.low %v79_v19, %v83_v20 }
   0xf   :  { %427 = vmatprep.subr.bf16.mxu0 %v788_v29  ;;  %468 = vmatprep.subr.bf16.mxu1 %v790_v30  ;;  %v764_v53 = vcombine.high %v45_v47, %v49_v48  ;;  %v766_v54 = vcombine.high %v46_v49, %v50_v50  ;;  %v37_v55 = vld [vmem:[%s1250_s3] sm:$0xff]  ;;  %v38_v57 = vld [vmem:[%s1250_s3 + $0x8] sm:$0xff]  ;;  %v763_v59 = vcombine.low %v45_v47, %v49_v48  ;;  %v71_v27 = vld [vmem:[%s1250_s3 + $0x110] sm:$0xff] }
  0x10   :  { %v41_v56 = vld [vmem:[%s1250_s3 + $0x20] sm:$0xff]  ;;  %v42_v58 = vld [vmem:[%s1250_s3 + $0x28] sm:$0xff]  ;;  %v765_v61 = vcombine.low %v46_v49, %v50_v50  ;;  %v802_v26 = vcombine.high %v80_v21, %v84_v22  ;;  %v75_v28 = vld [vmem:[%s1250_s3 + $0x130] sm:$0xff]  ;;  %v801_v32 = vcombine.low %v80_v21, %v84_v22 }
  0x11   :  { %v24_v60 = vld [vmem:[%s1251_s0] sm:$0xff]  ;;  %v756_v62 = vcombine.high %v37_v55, %v41_v56  ;;  %v758_v63 = vcombine.high %v38_v57, %v42_v58  ;;  %v755_v6 = vcombine.low %v37_v55, %v41_v56  ;;  %v757_v7 = vcombine.low %v38_v57, %v42_v58  ;;  %v72_v29 = vld [vmem:[%s1250_s3 + $0x118] sm:$0xff]  ;;  %v55_v42 = vld [vmem:[%s1250_s3 + $0x90] sm:$0xff] }
  0x12   :  { %428 = vmatpush1.bf16.msra.mxu0 %v787_v35  ;;  %469 = vmatpush1.bf16.msra.mxu1 %v789_v36  ;;  %v1040_v2 = vmul.f32 10.0, %v24_v60  ;;  %v76_v30 = vld [vmem:[%s1250_s3 + $0x138] sm:$0xff]  ;;  %v792_v33 = vcombine.high %v71_v27, %v75_v28  ;;  %v63_v35 = vld [vmem:[%s1250_s3 + $0xd0] sm:$0xff] }
  0x13   :  { %429 = vmatprep.subr.bf16.mxu0 %v780_v37  ;;  %470 = vmatprep.subr.bf16.mxu1 %v782_v38  ;;  %v794_v34 = vcombine.high %v72_v29, %v76_v30  ;;  %v67_v36 = vld [vmem:[%s1250_s3 + $0xf0] sm:$0xff]  ;;  %v68_v37 = vld [vmem:[%s1250_s3 + $0xf8] sm:$0xff]  ;;  %v791_v38 = vcombine.low %v71_v27, %v75_v28  ;;  %v793_v39 = vcombine.low %v72_v29, %v76_v30 }
  0x14   :  { %v1056_v12 = vpack.c.bf16 %v1040_v2, %v1040_v2  ;;  %v784_v40 = vcombine.high %v63_v35, %v67_v36  ;;  %v47_v50 = vld [vmem:[%s1250_s3 + $0x50] sm:$0xff]  ;;  %v40_v60 = vld [vmem:[%s1250_s3 + $0x18] sm:$0xff] }
  0x15   :  { %v39_v58 = vld [vmem:[%s1250_s3 + $0x10] sm:$0xff] }
  0x16   :  { %430 = vmatpush1.bf16.msra.mxu0 %v779_v43  ;;  %471 = vmatpush1.bf16.msra.mxu1 %v781_v44  ;;  %v59_v43 = vld [vmem:[%s1250_s3 + $0xb0] sm:$0xff]  ;;  %v56_v44 = vld [vmem:[%s1250_s3 + $0x98] sm:$0xff] }
  0x17   :  { %431 = vmatprep.subr.bf16.mxu0 %v772_v45  ;;  %472 = vmatprep.subr.bf16.mxu1 %v774_v46  ;;  %v60_v45 = vld [vmem:[%s1250_s3 + $0xb8] sm:$0xff]  ;;  %v783_v46 = vcombine.low %v63_v35, %v67_v36  ;;  %v776_v48 = vcombine.high %v55_v42, %v59_v43 }
  0x18   :  { %v778_v49 = vcombine.high %v56_v44, %v60_v45  ;;  %v777_v55 = vcombine.low %v56_v44, %v60_v45  ;;  %v655_v44 = vld [vmem:[%s1253_s2 + $0x40] sm:$0xff]  ;;  %v654_v45 = vld [vmem:[%s1253_s2 + $0x38] sm:$0xff] }
  0x1a   :  { %432 = vmatpush1.bf16.msra.mxu0 %v771_v51  ;;  %473 = vmatpush1.bf16.msra.mxu1 %v773_v52  ;;  %v51_v51 = vld [vmem:[%s1250_s3 + $0x70] sm:$0xff]  ;;  %v48_v52 = vld [vmem:[%s1250_s3 + $0x58] sm:$0xff] }
  0x1b   :  { %433 = vmatprep.subr.bf16.mxu0 %v764_v53  ;;  %474 = vmatprep.subr.bf16.mxu1 %v766_v54  ;;  %v52_v53 = vld [vmem:[%s1250_s3 + $0x78] sm:$0xff]  ;;  %v775_v54 = vcombine.low %v55_v42, %v59_v43  ;;  %v768_v56 = vcombine.high %v47_v50, %v51_v51  ;;  %v657_v42 = vld [vmem:[%s1253_s2 + $0x50] sm:$0xff]  ;;  %v656_v43 = vld [vmem:[%s1253_s2 + $0x48] sm:$0xff] }
  0x1c   :  { %v770_v57 = vcombine.high %v48_v52, %v52_v53 }
  0x1e   :  { %434 = vmatpush1.bf16.msra.mxu0 %v763_v59  ;;  %475 = vmatpush1.bf16.msra.mxu1 %v765_v61  ;;  %v43_v59 = vld [vmem:[%s1250_s3 + $0x30] sm:$0xff]  ;;  %v44_v61 = vld [vmem:[%s1250_s3 + $0x38] sm:$0xff] }
  0x1f   :  { %435 = vmatprep.subr.bf16.mxu0 %v756_v62  ;;  %476 = vmatprep.subr.bf16.mxu1 %v758_v63  ;;  %v767_v62 = vcombine.low %v47_v50, %v51_v51  ;;  %v769_v63 = vcombine.low %v48_v52, %v52_v53  ;;  %v760_v0 = vcombine.high %v39_v58, %v43_v59  ;;  %v649_v50 = vld [vmem:[%s1253_s2 + $0x10] sm:$0xff]  ;;  %v648_v51 = vld [vmem:[%s1253_s2 + $0x8] sm:$0xff]  ;;  %v647_v52 = vld [vmem:[%s1253_s2] sm:$0xff] }
  0x20   :  { %v762_v1 = vcombine.high %v40_v60, %v44_v61  ;;  %v759_v4 = vcombine.low %v39_v58, %v43_v59  ;;  %v761_v5 = vcombine.low %v40_v60, %v44_v61 }
  0x22   :  { %436 = vmatpush1.bf16.msra.mxu0 %v755_v6  ;;  %477 = vmatpush1.bf16.msra.mxu1 %v757_v7  ;;  %v27_v6 = vld [vmem:[%s1252_s1] sm:$0xff] }
  0x23   :  { %503 = vmatprep.subr.bf16.mxu0 %v816_v8  ;;  %544 = vmatprep.subr.bf16.mxu1 %v818_v9  ;;  %v28_v7 = vmul.f32 %v27_v6, %v1040_v2 }
  0x25   :  { %454 = vmatmul.mubr.bf16.vlgmr.msra.gmra.mxu0 %v1056_v12  ;;  %495 = vmatmul.mubr.bf16.vlgmr.msra.gmra.mxu1 %v1056_v12 }
  0x26   :  { %504 = vmatpush1.bf16.msra.mxu0 %v815_v15  ;;  %545 = vmatpush1.bf16.msra.mxu1 %v817_v16 }
  0x27   :  { %505 = vmatprep.subr.bf16.mxu0 %v808_v17  ;;  %546 = vmatprep.subr.bf16.mxu1 %v810_v18 }
  0x28   :  { %535 = vmatprep.mubr.bf16.mxu0 %v897_v3  ;;  %576 = vmatprep.mubr.bf16.mxu1 %v897_v3  ;;  %v64_v3 = vld [vmem:[%s1250_s3 + $0xd8] sm:$0xff] }
  0x29   :  { %v786_v41 = vcombine.high %v64_v3, %v68_v37  ;;  %v785_v47 = vcombine.low %v64_v3, %v68_v37  ;;  %29 = vadd.xlane.f32.xlu0 %v28_v7  ;;  %v899_v3 = vmov 0.0   ;;  %v662_v37 = vld [vmem:[%s1253_s2 + $0x78] sm:$0xff] }
  0x2a   :  { %506 = vmatpush1.bf16.msra.mxu0 %v807_v23  ;;  %547 = vmatpush1.bf16.msra.mxu1 %v809_v24 }
  0x2b   :  { %507 = vmatprep.subr.bf16.mxu0 %v800_v25  ;;  %548 = vmatprep.subr.bf16.mxu1 %v802_v26 }
  0x2e   :  { %508 = vmatpush1.bf16.msra.mxu0 %v799_v31  ;;  %549 = vmatpush1.bf16.msra.mxu1 %v801_v32  ;;  %v898_v32 = vmov 1.0  }
  0x2f   :  { %509 = vmatprep.subr.bf16.mxu0 %v792_v33  ;;  %550 = vmatprep.subr.bf16.mxu1 %v794_v34  ;;  %34 = vst.msk [vmem:[#allocation5] sm:$0xff] %vm31_vm0, %v898_v32 }
  0x32   :  { %510 = vmatpush1.bf16.msra.mxu0 %v791_v38  ;;  %551 = vmatpush1.bf16.msra.mxu1 %v793_v39  ;;  %v661_v38 = vld [vmem:[%s1253_s2 + $0x70] sm:$0xff]  ;;  %v660_v39 = vld [vmem:[%s1253_s2 + $0x68] sm:$0xff] }
  0x33   :  { %511 = vmatprep.subr.bf16.mxu0 %v784_v40  ;;  %552 = vmatprep.subr.bf16.mxu1 %v786_v41  ;;  %v659_v40 = vld [vmem:[%s1253_s2 + $0x60] sm:$0xff]  ;;  %v658_v41 = vld [vmem:[%s1253_s2 + $0x58] sm:$0xff] }
  0x36   :  { %512 = vmatpush1.bf16.msra.mxu0 %v783_v46  ;;  %553 = vmatpush1.bf16.msra.mxu1 %v785_v47  ;;  %v653_v46 = vld [vmem:[%s1253_s2 + $0x30] sm:$0xff]  ;;  %v652_v47 = vld [vmem:[%s1253_s2 + $0x28] sm:$0xff] }
  0x37   :  { %513 = vmatprep.subr.bf16.mxu0 %v776_v48  ;;  %554 = vmatprep.subr.bf16.mxu1 %v778_v49  ;;  %v651_v48 = vld [vmem:[%s1253_s2 + $0x20] sm:$0xff]  ;;  %v650_v49 = vld [vmem:[%s1253_s2 + $0x18] sm:$0xff] }
  0x3a   :  { %514 = vmatpush1.bf16.msra.mxu0 %v775_v54  ;;  %555 = vmatpush1.bf16.msra.mxu1 %v777_v55 }
  0x3b   :  { %515 = vmatprep.subr.bf16.mxu0 %v768_v56  ;;  %556 = vmatprep.subr.bf16.mxu1 %v770_v57 }
  0x3e   :  { %516 = vmatpush1.bf16.msra.mxu0 %v767_v62  ;;  %557 = vmatpush1.bf16.msra.mxu1 %v769_v63 }
  0x3f   :  { %517 = vmatprep.subr.bf16.mxu0 %v760_v0  ;;  %558 = vmatprep.subr.bf16.mxu1 %v762_v1 }
  0x42   :  { %518 = vmatpush1.bf16.msra.mxu0 %v759_v4  ;;  %559 = vmatpush1.bf16.msra.mxu1 %v761_v5 }
  0x43   :  { %836 = vmatprep.subr.mxu0 %v899_v3 }
  0x45   :  { %536 = vmatmul.mubr.bf16.vlgmr.msra.gmra.mxu0 %v1056_v12  ;;  %577 = vmatmul.mubr.bf16.vlgmr.msra.gmra.mxu1 %v1056_v12 }
  0x46   :  { %868 = vmatprep.mubr.msk.f32.mxu0 %vm900_vm1, %v899_v3  ;;  %837 = vmatpush3.msra.mxu0 %v662_v37 }
  0x47   :  { %838 = vmatprep.subr.mxu0 %v899_v3 }
  0x48   :  { %839 = vmatpush3.msra.mxu0 %v661_v38 }
  0x49   :  { %840 = vmatprep.subr.mxu0 %v899_v3 }
  0x4a   :  { %841 = vmatpush3.msra.mxu0 %v660_v39 }
  0x4b   :  { %842 = vmatprep.subr.mxu0 %v899_v3 }
  0x4c   :  { %843 = vmatpush3.msra.mxu0 %v659_v40 }
  0x4d   :  { %844 = vmatprep.subr.mxu0 %v899_v3 }
  0x4e   :  { %845 = vmatpush3.msra.mxu0 %v658_v41 }
  0x4f   :  { %846 = vmatprep.subr.mxu0 %v899_v3 }
  0x50   :  { %847 = vmatpush3.msra.mxu0 %v657_v42 }
  0x51   :  { %848 = vmatprep.subr.mxu0 %v899_v3 }
  0x52   :  { %849 = vmatpush3.msra.mxu0 %v656_v43 }
  0x53   :  { %850 = vmatprep.subr.mxu0 %v899_v3 }
  0x54   :  { %851 = vmatpush3.msra.mxu0 %v655_v44 }
  0x55   :  { %852 = vmatprep.subr.mxu0 %v899_v3 }
  0x56   :  { %853 = vmatpush3.msra.mxu0 %v654_v45 }
  0x57   :  { %854 = vmatprep.subr.mxu0 %v899_v3 }
  0x58   :  { %855 = vmatpush3.msra.mxu0 %v653_v46 }
  0x59   :  { %856 = vmatprep.subr.mxu0 %v899_v3 }
  0x5a   :  { %857 = vmatpush3.msra.mxu0 %v652_v47 }
  0x5b   :  { %858 = vmatprep.subr.mxu0 %v899_v3 }
  0x5c   :  { %859 = vmatpush3.msra.mxu0 %v651_v48 }
  0x5d   :  { %860 = vmatprep.subr.mxu0 %v899_v3 }
  0x5e   :  { %861 = vmatpush3.msra.mxu0 %v650_v49 }
  0x5f   :  { %862 = vmatprep.subr.mxu0 %v899_v3 }
  0x60   :  { %863 = vmatpush3.msra.mxu0 %v649_v50 }
  0x61   :  { %864 = vmatprep.subr.mxu0 %v899_v3 }
  0x62   :  { %865 = vmatpush3.msra.mxu0 %v648_v51 }
  0x63   :  { %866 = vmatprep.subr.mxu0 %v899_v3 }
  0x64   :  { %867 = vmatpush3.msra.mxu0 %v647_v52 }
  0x65   :  { %869 = vmatmul.mubr.f32.vlgmr.msra.gmra.mxu0 %v1040_v2 }
  0xb2   :  { %v30_v31 = vpop.xlane.xlu0 %29 }
  0xb3   :  { %32 = vst.msk [vmem:[#allocation3] sm:$0xff] %vm31_vm0, %v30_v31  ;;  %33 = vst.msk [vmem:[#allocation4] sm:$0xff] %vm31_vm0, %v30_v31 }
  0xba   :  { %v1173_v33 = vld [vmem:[#allocation4] sm:$0xff]  ;;  %v739_v37 = vld [vmem:[#allocation3] sm:$0xff] }
  0xe5   :  { %v1146_v8 = vpop.f32.mrf.mxu0  ;;  %v1148_v9 = vpop.f32.mrf.mxu1 }
  0xe7   :  { %v1150_v10 = vpop.f32.mrf.mxu0  ;;  %v1152_v11 = vpop.f32.mrf.mxu1 }
  0xe9   :  { %v459_v13 = vpop.f32.mrf.mxu0  ;;  %v500_v14 = vpop.f32.mrf.mxu1 }
  0xeb   :  { %v460_v15 = vpop.f32.mrf.mxu0  ;;  %v501_v16 = vpop.f32.mrf.mxu1 }
 0x105   :  { %v1154_v12 = vpop.f32.mrf.mxu0  ;;  %v1156_v17 = vpop.f32.mrf.mxu1 }
 0x106   :  { %v586_v19 = vmax.f32 %v1146_v8, %v1154_v12  ;;  %v588_v22 = vmax.f32 %v1148_v9, %v1156_v17 }
 0x107   :  { %v1158_v18 = vpop.f32.mrf.mxu0  ;;  %v1164_v21 = vpop.f32.mrf.mxu1 }
 0x108   :  { %v587_v20 = vmax.f32 %v1150_v10, %v1158_v18  ;;  %v589_v23 = vmax.f32 %v1152_v11, %v1164_v21 }
 0x109   :  { %v541_v24 = vpop.f32.mrf.mxu0  ;;  %v582_v25 = vpop.f32.mrf.mxu1 }
 0x10a   :  { %v590_v26 = vmax.f32 %v586_v19, %v587_v20  ;;  %v591_v28 = vmax.f32 %v588_v22, %v589_v23 }
 0x10b   :  { %v542_v27 = vpop.f32.mrf.mxu0  ;;  %v583_v29 = vpop.f32.mrf.mxu1 }
 0x10c   :  { %v592_v30 = vmax.f32 %v590_v26, %v591_v28  ;;  %v596_v26 = vld [vmem:[#allocation5] sm:$0xff] }
 0x10e   :  { %593 = vmax.xlane.f32.xlu0 %v592_v30 }
 0x125   :  { %v729_v22 = vpop.f32.mrf.mxu0 }
 0x126   :  { %733 = vst [vmem:[%s1254_s5] sm:$0xff] %v729_v22 }
 0x127   :  { %v870_v23 = vpop.f32.mrf.mxu0 }
 0x197   :  { %v594_v34 = vpop.xlane.xlu0 %593 }
 0x198   :  { %v1176_v35 = vmax.f32 %v1173_v33, %v594_v34 }
 0x19a   :  { %v597_v36 = vsub.f32 %v1173_v33, %v1176_v35  ;;  %642 = vst.msk [vmem:[#allocation4] sm:$0xff] %vm31_vm0, %v1176_v35  ;;  %603 = vperm.xlu1 %875, %v1176_v35  }
 0x19c   :  { %v598_v24 = vmul.f32 1.442695, %v597_v36 }
 0x1a1   :  { %v734_v34 = vld [vmem:[#allocation4] sm:$0xff] }
 0x215   :  { %v604_v53 = vpop.permute.xlu1 %603 }
 0x216   :  { %v606_v54 = vsub.f32 %v1146_v8, %v604_v53  ;;  %v607_v55 = vsub.f32 %v1150_v10, %v604_v53  ;;  %v608_v56 = vsub.f32 %v1148_v9, %v604_v53  ;;  %v609_v57 = vsub.f32 %v1152_v11, %v604_v53 }
 0x217   :  { %v610_v60 = vsub.f32 %v1154_v12, %v604_v53  ;;  %v611_v62 = vsub.f32 %v1158_v18, %v604_v53  ;;  %v612_v0 = vsub.f32 %v1156_v17, %v604_v53  ;;  %v613_v1 = vsub.f32 %v1164_v21, %v604_v53 }
 0x218   :  { %v614_v58 = vmul.f32 1.442695, %v606_v54  ;;  %v616_v59 = vmul.f32 1.442695, %v607_v55  ;;  %v618_v61 = vmul.f32 1.442695, %v608_v56 }
 0x219   :  { %v620_v63 = vmul.f32 1.442695, %v609_v57  ;;  %v622_v2 = vmul.f32 1.442695, %v610_v60  ;;  %v624_v4 = vmul.f32 1.442695, %v611_v62 }
 0x21a   :  { %877 = vpow2.f32 %v614_v58  ;;  %v626_v5 = vmul.f32 1.442695, %v612_v0  ;;  %v628_v6 = vmul.f32 1.442695, %v613_v1 }
 0x21b   :  { %879 = vpow2.f32 %v616_v59 }
 0x21c   :  { %881 = vpow2.f32 %v618_v61 }
 0x21d   :  { %883 = vpow2.f32 %v620_v63 }
 0x21e   :  { %885 = vpow2.f32 %v622_v2 }
 0x21f   :  { %887 = vpow2.f32 %v624_v4 }
 0x220   :  { %889 = vpow2.f32 %v626_v5 }
 0x221   :  { %891 = vpow2.f32 %v628_v6 }
 0x222   :  { %893 = vpow2.f32 %v598_v24 }
 0x227   :  { %v878_v7 = vpop.eup %877 }
 0x228   :  { %v880_v8 = vpop.eup %879 }
 0x229   :  { %v630_v9 = vadd.f32 %v880_v8, %v878_v7  ;;  %v882_v10 = vpop.eup %881 }
 0x22a   :  { %v884_v13 = vpop.eup %883 }
 0x22b   :  { %v631_v11 = vadd.f32 %v882_v10, %v630_v9  ;;  %v886_v15 = vpop.eup %885 }
 0x22c   :  { %v888_v12 = vpop.eup %887 }
 0x22d   :  { %v632_v14 = vadd.f32 %v884_v13, %v631_v11  ;;  %v890_v18 = vpop.eup %889 }
 0x22e   :  { %v892_v20 = vpop.eup %891 }
 0x22f   :  { %v633_v16 = vadd.f32 %v886_v15, %v632_v14  ;;  %v894_v25 = vpop.eup %893 }
 0x230   :  { %v600_v27 = vmul.f32 %v894_v25, %v596_v26 }
 0x231   :  { %v634_v17 = vadd.f32 %v888_v12, %v633_v16 }
 0x233   :  { %v635_v19 = vadd.f32 %v890_v18, %v634_v17 }
 0x235   :  { %v636_v21 = vadd.f32 %v892_v20, %v635_v19 }
 0x237   :  { %637 = vadd.xlane.f32.xlu1 %v636_v21 }
 0x2c0   :  { %v638_v28 = vpop.xlane.xlu1 %637 }
 0x2c1   :  { %v639_v29 = vadd.f32 %v638_v28, %v600_v27 }
 0x2c3   :  { %641 = vst.msk [vmem:[#allocation5] sm:$0xff] %vm31_vm0, %v639_v29 }
 0x2ca   :  { %v735_v30 = vld [vmem:[#allocation5] sm:$0xff] }
 0x2cb   :  { %895 = vlog2.f32 %v735_v30 }
 0x2d8   :  { %v896_v31 = vpop.eup %895 }
 0x2d9   :  { %v737_v32 = vmul.f32 0.6931472, %v896_v31 }
 0x2db   :  { %v738_v3 = vadd.f32 %v737_v32, %v734_v34 }
 0x2dd   :  { %v740_v38 = vsub.f32 %v738_v3, %v739_v37 }
 0x2df   :  { %743 = vperm.xlu0 %876, %v740_v38  }
 0x35a   :  { %v744_v39 = vpop.permute.xlu0 %743 }
 0x35b   :  { %746 = vst [vmem:[%s1255_s4] sm:$0xff] %v744_v39 }

</bundles_post_ra>
